<compile_context>
chip_gen: v7x
topology: tpu7x:2x2x1
jax: 0.10.0
libtpu: 0.0.40
codegen_flags: <defaults>
</compile_context>

<pallas_src>
import functools

import jax
import jax.numpy as jnp
from jax.experimental import pallas as pl
from jax.experimental.pallas import tpu as pltpu


_LANE = 128            # TPU lane width: output features padded to this for lane-dense stores.
_SMALL_PATH_ELEMS = 4096  # below this, plain XLA beats the Pallas custom-call overhead.


def policy_kernel(x_ref, w1_ref, b1_ref, w3_ref, b3_ref, out_ref):
    """Fused fc1 -> ReLU -> fc3 on one [TB, *] batch tile.

    Matmuls run on the MXU (bf16 or f32 inputs, f32 accumulation); bias-add and
    ReLU are done in f32 on the VPU.
    """
    x = x_ref[...]                                                    # [TB, Din]
    h = jnp.dot(x, w1_ref[...], preferred_element_type=jnp.float32)  # MXU, f32 acc
    h = jnp.maximum(h + b1_ref[...], 0.0)                            # f32 bias + ReLU (VPU)
    h = h.astype(w3_ref.dtype)                                       # back to MXU input dtype
    o = jnp.dot(h, w3_ref[...], preferred_element_type=jnp.float32)  # MXU, f32 acc
    out_ref[...] = (o + b3_ref[...]).astype(out_ref.dtype)           # lane-dense store


def _reference_forward(x, w1, b1, w3, b3):
    """Plain-XLA path; also the numerics reference."""
    return jnp.maximum(x @ w1 + b1, 0.0) @ w3 + b3


@functools.partial(jax.jit, static_argnames=("block_b", "compute_dtype"))
def policy_forward_pallas(x, w1, b1, w3, b3, *, block_b=256,
                          compute_dtype=jnp.bfloat16):
    out_dtype = x.dtype
    B, Din = x.shape
    H = w1.shape[1]
    A = w3.shape[1]

    # Sublane-rounded batch tile (8 for f32, 16 for bf16); batch padded to whole tiles.
    sub = 16 if jnp.dtype(compute_dtype).itemsize < 4 else 8
    tb = max(sub, ((min(block_b, B) + sub - 1) // sub) * sub)
    b_pad = pl.cdiv(B, tb) * tb

    # Lane-dense output: pad n_actions up to a multiple of 128 (zeros), slice later.
    a_pad = pl.cdiv(A, _LANE) * _LANE

    xp = jnp.zeros((b_pad, Din), compute_dtype).at[:B].set(x.astype(compute_dtype))
    w1c = w1.astype(compute_dtype)
    w3p = jnp.zeros((H, a_pad), compute_dtype).at[:, :A].set(w3.astype(compute_dtype))
    b1f = b1.astype(jnp.float32)
    b3p = jnp.zeros((1, a_pad), jnp.float32).at[:, :A].set(b3.astype(jnp.float32))

    itemsize = jnp.dtype(compute_dtype).itemsize
    flops = 2 * b_pad * (Din * H + H * a_pad)
    bytes_accessed = (b_pad * Din * itemsize          # x stream in
                      + Din * H * itemsize            # w1 (resident, read once)
                      + H * a_pad * itemsize          # w3 (resident, read once)
                      + (H + a_pad) * 4               # biases (f32)
                      + b_pad * a_pad * jnp.dtype(out_dtype).itemsize)  # out stream

    out = pl.pallas_call(
        policy_kernel,
        out_shape=jax.ShapeDtypeStruct((b_pad, a_pad), out_dtype),
        grid=(b_pad // tb,),
        in_specs=[
            pl.BlockSpec((tb, Din), lambda i: (i, 0)),     # activation stream: tiled on batch
            pl.BlockSpec((Din, H), lambda i: (0, 0)),      # weights / biases: VMEM-resident,
            pl.BlockSpec((1, H), lambda i: (0, 0)),        #   DMA'd once across the grid
            pl.BlockSpec((H, a_pad), lambda i: (0, 0)),
            pl.BlockSpec((1, a_pad), lambda i: (0, 0)),
        ],
        out_specs=pl.BlockSpec((tb, a_pad), lambda i: (i, 0)),
        compiler_params=pltpu.CompilerParams(
            # batch tiles are independent -> shard across v7x's 2 TensorCores
            dimension_semantics=("parallel",),
        ),
        cost_estimate=pl.CostEstimate(
            flops=flops, transcendentals=0, bytes_accessed=bytes_accessed),
    )(xp, w1c, b1f, w3p, b3p)

    return out[:B, :A]


def policy_forward(x, w1, b1, w3, b3, *, block_b=256, compute_dtype=jnp.bfloat16):
    """PolicyNetwork.forward: relu(fc1(x)) -> fc3 (fc2 intentionally unused)."""
    B, Din = x.shape
    H = w1.shape[1]
    # Tiny single-observation path: fixed custom-call launch cost dominates; XLA wins.
    if B * max(Din, H) < _SMALL_PATH_ELEMS:
        return _reference_forward(x, w1, b1, w3, b3)
    return policy_forward_pallas(x, w1, b1, w3, b3,
                                 block_b=block_b, compute_dtype=compute_dtype)


def init_linear(key, fan_in, fan_out, dtype=jnp.float32):
    """Deterministic init mimicking torch.nn.Linear default (U[-1/sqrt(fan_in), +])."""
    kw, kb = jax.random.split(key)
    bound = 1.0 / jnp.sqrt(jnp.asarray(fan_in, dtype))
    # Stored already transposed: [fan_in, fan_out]
    w = jax.random.uniform(kw, (fan_in, fan_out), dtype, minval=-bound, maxval=bound)
    b = jax.random.uniform(kb, (1, fan_out), dtype, minval=-bound, maxval=bound)
    return w, b


if __name__ == "__main__":
    # Module config (fc1_dims == fc2_dims, as required by the original forward).
    input_dims = (8,)
    fc1_dims = 32
    fc2_dims = 32
    n_actions = 4

    key = jax.random.PRNGKey(0)
    k_small, k_batch, k1, k2, k3 = jax.random.split(key, 5)

    # Parameters (fc2 exists in __init__ but is unused in forward — kept that way).
    w1, b1 = init_linear(k1, input_dims[0], fc1_dims)
    _w2, _b2 = init_linear(k2, fc1_dims, fc2_dims)   # unused in forward (matches PyTorch)
    w3, b3 = init_linear(k3, fc2_dims, n_actions)

    # ---- batched path: Pallas kernel ----
    batch = 512
    obs_batch = jax.random.normal(k_batch, (batch, input_dims[0]), jnp.float32)
    ref_batch = _reference_forward(obs_batch, w1, b1, w3, b3)

    # Exact-f32 mode: tight check of the kernel plumbing (padding, grid, biases).
    out_f32 = jax.block_until_ready(
        policy_forward_pallas(obs_batch, w1, b1, w3, b3,
                              block_b=256, compute_dtype=jnp.float32))
    assert out_f32.shape == (batch, n_actions)
    assert jnp.allclose(out_f32, ref_batch, atol=1e-5, rtol=1e-5)

    # bf16-to-MXU mode (the perf default): loose sanity bound vs the f32 reference.
    out_bf16 = jax.block_until_ready(
        policy_forward_pallas(obs_batch, w1, b1, w3, b3,
                              block_b=256, compute_dtype=jnp.bfloat16))
    assert out_bf16.shape == (batch, n_actions)
    assert jnp.allclose(out_bf16, ref_batch, atol=1e-1, rtol=1e-1)

    # ---- tiny single-observation path: dispatches to plain XLA (no custom call) ----
    obs_small = jax.random.normal(k_small, (2, input_dims[0]), jnp.float32)
    out_small = jax.block_until_ready(policy_forward(obs_small, w1, b1, w3, b3))
    ref_small = _reference_forward(obs_small, w1, b1, w3, b3)
    assert out_small.shape == (2, n_actions)
    assert jnp.allclose(out_small, ref_small, atol=1e-5, rtol=1e-5)

    print("KERNEL_OK")
</pallas_src>

<mosaic_0001>
module attributes {stable_mosaic.version = 11 : i64} {
  func.func @policy_kernel(%arg0: i32, %arg1: memref<256x8xf32, #tpu.memory_space<vmem>>, %arg2: memref<8x32xf32, #tpu.memory_space<vmem>>, %arg3: memref<1x32xf32, #tpu.memory_space<vmem>>, %arg4: memref<32x128xf32, #tpu.memory_space<vmem>>, %arg5: memref<1x128xf32, #tpu.memory_space<vmem>>, %arg6: memref<256x128xf32, #tpu.memory_space<vmem>>) attributes {dimension_semantics = [#tpu.dimension_semantics<parallel>], iteration_bounds = array<i64: 2>, scalar_prefetch = 0 : i64, scratch_operands = 0 : i64, tpu.core_type = #tpu.core_type<tc>, window_params = [{transform_indices = @transform_0, window_bounds = array<i64: 256, 8>}, {pipeline_mode = #tpu.pipeline_mode<synchronous>, transform_indices = @transform_1, window_bounds = array<i64: 8, 32>}, {pipeline_mode = #tpu.pipeline_mode<synchronous>, transform_indices = @transform_2, window_bounds = array<i64: 1, 32>}, {pipeline_mode = #tpu.pipeline_mode<synchronous>, transform_indices = @transform_3, window_bounds = array<i64: 32, 128>}, {pipeline_mode = #tpu.pipeline_mode<synchronous>, transform_indices = @transform_4, window_bounds = array<i64: 1, 128>}, {transform_indices = @transform_5, window_bounds = array<i64: 256, 128>}]} {
    %c0 = arith.constant 0 : index
    %c0_0 = arith.constant 0 : index
    %0 = vector.load %arg1[%c0, %c0_0] : memref<256x8xf32, #tpu.memory_space<vmem>>, vector<256x8xf32>
    %c0_1 = arith.constant 0 : index
    %c0_2 = arith.constant 0 : index
    %1 = vector.load %arg2[%c0_1, %c0_2] : memref<8x32xf32, #tpu.memory_space<vmem>>, vector<8x32xf32>
    %cst = arith.constant dense<0.000000e+00> : vector<256x32xf32>
    %2 = tpu.matmul %0, %1, %cst {dimension_numbers = #tpu.dot_dimension_numbers<[1], [0], [0], [1], [0, 0, 1, 1], [], []>} : vector<256x8xf32>, vector<8x32xf32>, vector<256x32xf32> -> vector<256x32xf32>
    %c0_3 = arith.constant 0 : index
    %c0_4 = arith.constant 0 : index
    %3 = vector.load %arg3[%c0_3, %c0_4] : memref<1x32xf32, #tpu.memory_space<vmem>>, vector<1x32xf32>
    %4 = vector.broadcast %3 : vector<1x32xf32> to vector<256x32xf32>
    %5 = arith.addf %2, %4 : vector<256x32xf32>
    %cst_5 = arith.constant 0.000000e+00 : f32
    %6 = vector.broadcast %cst_5 : f32 to vector<256x32xf32>
    %7 = arith.maximumf %5, %6 : vector<256x32xf32>
    %c0_6 = arith.constant 0 : index
    %c0_7 = arith.constant 0 : index
    %8 = vector.load %arg4[%c0_6, %c0_7] : memref<32x128xf32, #tpu.memory_space<vmem>>, vector<32x128xf32>
    %cst_8 = arith.constant dense<0.000000e+00> : vector<256x128xf32>
    %9 = tpu.matmul %7, %8, %cst_8 {dimension_numbers = #tpu.dot_dimension_numbers<[1], [0], [0], [1], [0, 0, 1, 1], [], []>} : vector<256x32xf32>, vector<32x128xf32>, vector<256x128xf32> -> vector<256x128xf32>
    %c0_9 = arith.constant 0 : index
    %c0_10 = arith.constant 0 : index
    %10 = vector.load %arg5[%c0_9, %c0_10] : memref<1x128xf32, #tpu.memory_space<vmem>>, vector<1x128xf32>
    %11 = vector.broadcast %10 : vector<1x128xf32> to vector<256x128xf32>
    %12 = arith.addf %9, %11 : vector<256x128xf32>
    %c0_11 = arith.constant 0 : index
    %c0_12 = arith.constant 0 : index
    %13 = vector.load %arg6[%c0_11, %c0_12] : memref<256x128xf32, #tpu.memory_space<vmem>>, vector<256x128xf32>
    tpu.vector_store %arg6[%c0_11, %c0_12], %12 {strides = array<i32>} : memref<256x128xf32, #tpu.memory_space<vmem>>, vector<256x128xf32>,
    return
  }
  func.func @transform_0(%arg0: i32) -> (i32, i32) {
    %c0_i32 = arith.constant 0 : i32
    %c0_i32_0 = arith.constant 0 : i32
    return %arg0, %c0_i32 : i32, i32
  }
  func.func @transform_1(%arg0: i32) -> (i32, i32) {
    %c0_i32 = arith.constant 0 : i32
    %c0_i32_0 = arith.constant 0 : i32
    %c0_i32_1 = arith.constant 0 : i32
    return %c0_i32, %c0_i32_0 : i32, i32
  }
  func.func @transform_2(%arg0: i32) -> (i32, i32) {
    %c0_i32 = arith.constant 0 : i32
    %c0_i32_0 = arith.constant 0 : i32
    %c0_i32_1 = arith.constant 0 : i32
    return %c0_i32, %c0_i32_0 : i32, i32
  }
  func.func @transform_3(%arg0: i32) -> (i32, i32) {
    %c0_i32 = arith.constant 0 : i32
    %c0_i32_0 = arith.constant 0 : i32
    %c0_i32_1 = arith.constant 0 : i32
    return %c0_i32, %c0_i32_0 : i32, i32
  }
  func.func @transform_4(%arg0: i32) -> (i32, i32) {
    %c0_i32 = arith.constant 0 : i32
    %c0_i32_0 = arith.constant 0 : i32
    %c0_i32_1 = arith.constant 0 : i32
    return %c0_i32, %c0_i32_0 : i32, i32
  }
  func.func @transform_5(%arg0: i32) -> (i32, i32) {
    %c0_i32 = arith.constant 0 : i32
    %c0_i32_0 = arith.constant 0 : i32
    return %arg0, %c0_i32 : i32, i32
  }
}

</mosaic_0001>

<bundles_post_ra>
// kernel: policy_forward_pallas.1
= control target key start
LH: loop header
LB: loop body
LE: loop exit
PB: predicated region body
PF: predicated region fallthrough
CT: control target
= control target key end

     0   :  { %s1349_s18 = smov 0   ;;  %s1594_s0 = inlined_call_operand.vmem [shape: f32[512,8], index: 0, kind: input, shape index: {}]   ;;  %s1595_s1 = inlined_call_operand.vmem [shape: f32[8,32], index: 1, kind: input, shape index: {}]   ;;  %s1596_s2 = inlined_call_operand.vmem [shape: f32[1,32], index: 2, kind: input, shape index: {}]   ;;  %s1597_s3 = inlined_call_operand.vmem [shape: f32[32,128], index: 3, kind: input, shape index: {}]   ;;  %s1598_s4 = inlined_call_operand.vmem [shape: f32[1,128], index: 4, kind: input, shape index: {}]   ;;  %s1599_s5 = inlined_call_operand.vmem [shape: f32[512,128], index: 5, kind: output, shape index: {}]  }
   0x1 LB: > { %s1043_s19 = sadd.s32 4294967295, %s1317_s18   ;;  %p1047_p0 = scmp.ge.s32.totalorder %s1317_s18, 1  ;;  %s1317_s18 = sphi %s1349_s18, %s15_s18  }
   0x2   : > { %p188_p1 = scmp.lt.s32.totalorder %s1317_s18, 3 }
   0x4   : > { %p189_p2 = pnand %p1047_p0, %p188_p1 }
   0x5   : > { %v260_v0 = vld [vmem:[%s1595_s1] sm:$0xff] (!%p189_p2)  ;;  %s1048_s22 = sshll.u32 (!%p189_p2), %s1043_s19, 5  ;;  %v623_v2 = vld [vmem:[%s1597_s3 + $0x8] sm:$0xff] (!%p189_p2)  ;;  %vm268_vm0 = vcmask (!%p189_p2), 64512   ;;  %v624_v36 = vld [vmem:[%s1597_s3 + $0x10] sm:$0xff] (!%p189_p2)  ;;  %vm633_vm1 = vcmask (!%p189_p2), 261120  }
   0x6   : > { %192 = sbr.rel (%p189_p2) target bundleno = 512 (0x200), region = 40  ;;  %v622_v1 = vld [vmem:[%s1597_s3] sm:$0xff] (!%p189_p2)  ;;  %1189 = vmatprep.subr.mxu0 (!%p189_p2), %v260_v0  ;;  %p217_p3 = scmp.lt.s32.totalorder (!%p189_p2), %s1048_s22, 63  ;;  %v625_v37 = vld [vmem:[%s1597_s3 + $0x18] sm:$0xff] (!%p189_p2) }
   0x7   : > { %v1295_v3 = vpack.c.bf16 (!%p189_p2), %v623_v2, %v622_v1  ;;  %1190 = vmatpush3.msra.mxu0 (!%p189_p2), %v260_v0  ;;  %v1299_v38 = vpack.c.bf16 (!%p189_p2), %v625_v37, %v624_v36  ;;  %v1449_v39 = vld [vmem:[%s1596_s2] ss:$0 sm:$0xff] (!%p189_p2) }
   0x9   : > { %1296 = vmatprep.subr.bf16.mxu1 (!%p189_p2), %v1295_v3 }
   0xa   : > { %1298 = vmatpush3.bf16.msra.mxu1 (!%p189_p2), %v1295_v3 }
   0xb   : > { %1300 = vmatprep.subr.bf16.mxu1 (!%p189_p2), %v1299_v38 }
   0xd   : > { %s1601_s22 = smov (!%p217_p3, %s1048_s22), 63 }
   0xe   : > { %s1049_s27 = sshll.u32 %s1601_s22, 3  ;;  %1302 = vmatpush3.bf16.msra.mxu1 %v1299_v38 }
   0xf   : > { %s1374_s30 = scalar_lea.vmem %s1594_s0, %s1049_s27  ;;  %s1525_s16 = scalar_lea.vmem %s1599_s5, %s1049_s27 }
  0x10   : > { %v228_v4 = vld [vmem:[%s1374_s30] sm:$0xff]  ;;  %v229_v5 = vld [vmem:[%s1374_s30 + $0x8] sm:$0xff]  ;;  %v230_v6 = vld [vmem:[%s1374_s30 + $0x10] sm:$0xff] }
  0x11   : > { %1191 = vmatprep.mubr.msk.f32.mxu0 %vm268_vm0, %v228_v4  ;;  %v231_v7 = vld [vmem:[%s1374_s30 + $0x18] sm:$0xff]  ;;  %v232_v8 = vld [vmem:[%s1374_s30 + $0x20] sm:$0xff]  ;;  %v233_v9 = vld [vmem:[%s1374_s30 + $0x28] sm:$0xff] }
  0x12   : > { %1192 = vmatmul.mubr.msk.f32.vlgmr.msra.gmra.mrb[0].mxu0 %vm268_vm0, %v229_v5  ;;  %v234_v10 = vld [vmem:[%s1374_s30 + $0x30] sm:$0xff]  ;;  %v235_v11 = vld [vmem:[%s1374_s30 + $0x38] sm:$0xff]  ;;  %v236_v12 = vld [vmem:[%s1374_s30 + $0x40] sm:$0xff] }
  0x13   : > { %1194 = vmatprep.mubr.msk.f32.mxu0 %vm268_vm0, %v230_v6  ;;  %v237_v13 = vld [vmem:[%s1374_s30 + $0x48] sm:$0xff]  ;;  %v238_v14 = vld [vmem:[%s1374_s30 + $0x50] sm:$0xff]  ;;  %v239_v15 = vld [vmem:[%s1374_s30 + $0x58] sm:$0xff] }
  0x14   : > { %v240_v16 = vld [vmem:[%s1374_s30 + $0x60] sm:$0xff]  ;;  %v241_v17 = vld [vmem:[%s1374_s30 + $0x68] sm:$0xff]  ;;  %v242_v18 = vld [vmem:[%s1374_s30 + $0x70] sm:$0xff] }
  0x15   : > { %v243_v19 = vld [vmem:[%s1374_s30 + $0x78] sm:$0xff]  ;;  %v244_v20 = vld [vmem:[%s1374_s30 + $0x80] sm:$0xff]  ;;  %v245_v21 = vld [vmem:[%s1374_s30 + $0x88] sm:$0xff] }
  0x16   : > { %1195 = vmatmul.mubr.msk.f32.gmra.mrb[2].mxu0 %vm268_vm0, %v231_v7  ;;  %v246_v22 = vld [vmem:[%s1374_s30 + $0x90] sm:$0xff]  ;;  %v247_v23 = vld [vmem:[%s1374_s30 + $0x98] sm:$0xff]  ;;  %v248_v24 = vld [vmem:[%s1374_s30 + $0xa0] sm:$0xff] }
  0x17   : > { %1197 = vmatprep.mubr.msk.f32.mxu0 %vm268_vm0, %v232_v8  ;;  %v249_v25 = vld [vmem:[%s1374_s30 + $0xa8] sm:$0xff]  ;;  %v250_v26 = vld [vmem:[%s1374_s30 + $0xb0] sm:$0xff]  ;;  %v251_v27 = vld [vmem:[%s1374_s30 + $0xb8] sm:$0xff] }
  0x18   : > { %v252_v28 = vld [vmem:[%s1374_s30 + $0xc0] sm:$0xff]  ;;  %v253_v29 = vld [vmem:[%s1374_s30 + $0xc8] sm:$0xff]  ;;  %v254_v30 = vld [vmem:[%s1374_s30 + $0xd0] sm:$0xff] }
  0x19   : > { %v255_v31 = vld [vmem:[%s1374_s30 + $0xd8] sm:$0xff]  ;;  %v256_v32 = vld [vmem:[%s1374_s30 + $0xe0] sm:$0xff]  ;;  %v257_v33 = vld [vmem:[%s1374_s30 + $0xe8] sm:$0xff] }
  0x1a   : > { %1198 = vmatmul.mubr.msk.f32.gmra.mrb[4].mxu0 %vm268_vm0, %v233_v9  ;;  %v258_v34 = vld [vmem:[%s1374_s30 + $0xf0] sm:$0xff]  ;;  %v259_v35 = vld [vmem:[%s1374_s30 + $0xf8] sm:$0xff] }
  0x1b   : > { %1200 = vmatprep.mubr.msk.f32.mxu0 %vm268_vm0, %v234_v10 }
  0x1e   : > { %1201 = vmatmul.mubr.msk.f32.gmra.mrb[6].mxu0 %vm268_vm0, %v235_v11 }
  0x1f   : > { %1203 = vmatprep.mubr.msk.f32.mxu0 %vm268_vm0, %v236_v12 }
  0x22   : > { %1204 = vmatmul.mubr.msk.f32.gmra.mrb[8].mxu0 %vm268_vm0, %v237_v13 }
  0x23   : > { %1206 = vmatprep.mubr.msk.f32.mxu0 %vm268_vm0, %v238_v14 }
  0x26   : > { %1207 = vmatmul.mubr.msk.f32.gmra.mrb[10].mxu0 %vm268_vm0, %v239_v15 }
  0x27   : > { %1209 = vmatprep.mubr.msk.f32.mxu0 %vm268_vm0, %v240_v16 }
  0x2a   : > { %1210 = vmatmul.mubr.msk.f32.gmra.mrb[12].mxu0 %vm268_vm0, %v241_v17 }
  0x2b   : > { %1212 = vmatprep.mubr.msk.f32.mxu0 %vm268_vm0, %v242_v18 }
  0x2e   : > { %1213 = vmatmul.mubr.msk.f32.gmra.mrb[14].mxu0 %vm268_vm0, %v243_v19 }
  0x2f   : > { %1215 = vmatprep.mubr.msk.f32.mxu0 %vm268_vm0, %v244_v20 }
  0x32   : > { %1216 = vmatmul.mubr.msk.f32.gmra.mrb[16].mxu0 %vm268_vm0, %v245_v21 }
  0x33   : > { %1218 = vmatprep.mubr.msk.f32.mxu0 %vm268_vm0, %v246_v22 }
  0x36   : > { %1219 = vmatmul.mubr.msk.f32.gmra.mrb[18].mxu0 %vm268_vm0, %v247_v23 }
  0x37   : > { %1221 = vmatprep.mubr.msk.f32.mxu0 %vm268_vm0, %v248_v24 }
  0x3a   : > { %1222 = vmatmul.mubr.msk.f32.gmra.mrb[20].mxu0 %vm268_vm0, %v249_v25 }
  0x3b   : > { %1224 = vmatprep.mubr.msk.f32.mxu0 %vm268_vm0, %v250_v26 }
  0x3e   : > { %1225 = vmatmul.mubr.msk.f32.gmra.mrb[22].mxu0 %vm268_vm0, %v251_v27 }
  0x3f   : > { %1227 = vmatprep.mubr.msk.f32.mxu0 %vm268_vm0, %v252_v28 }
  0x42   : > { %1228 = vmatmul.mubr.msk.f32.gmra.mrb[24].mxu0 %vm268_vm0, %v253_v29 }
  0x43   : > { %1230 = vmatprep.mubr.msk.f32.mxu0 %vm268_vm0, %v254_v30 }
  0x46   : > { %1231 = vmatmul.mubr.msk.f32.gmra.mrb[26].mxu0 %vm268_vm0, %v255_v31 }
  0x47   : > { %1233 = vmatprep.mubr.msk.f32.mxu0 %vm268_vm0, %v256_v32 }
  0x4a   : > { %1234 = vmatmul.mubr.msk.f32.gmra.mrb[28].mxu0 %vm268_vm0, %v257_v33 }
  0x4b   : > { %1236 = vmatprep.mubr.msk.f32.mxu0 %vm268_vm0, %v258_v34 }
  0x4e   : > { %1237 = vmatmul.mubr.msk.f32.gmra.mrb[30].mxu0 %vm268_vm0, %v259_v35 }
  0xe5   : > { %v1193_v40 = vpop.f32.mrb[0].mxu0 }
  0xe6   : > { %v437_v41 = vadd.f32 %v1193_v40, %v1449_v39  ;;  %v431_v42 = vpop.f32.mrb[1].mxu0 }
  0xe7   : > { %v432_v43 = vadd.f32 %v1449_v39, %v431_v42 }
  0xe8   : > { %v591_v46 = vmax.f32 %v437_v41, 0.0 }
  0xe9   : > { %v590_v44 = vmax.f32 %v432_v43, 0.0  ;;  %v1196_v45 = vpop.f32.mrb[2].mxu0 }
  0xea   : > { %v447_v47 = vadd.f32 %v1196_v45, %v1449_v39  ;;  %v441_v48 = vpop.f32.mrb[3].mxu0 }
  0xeb   : > { %v442_v49 = vadd.f32 %v1449_v39, %v441_v48  ;;  %1247 = vmatprep.mubr.msk.f32.mxu1 %vm633_vm1, %v590_v44 }
  0xec   : > { %1248 = vmatmul.mubr.msk.f32.vlgmr.msra.gmra.mrb[0].mxu1 %vm633_vm1, %v591_v46  ;;  %v593_v52 = vmax.f32 %v447_v47, 0.0 }
  0xed   : > { %v592_v50 = vmax.f32 %v442_v49, 0.0  ;;  %v1199_v51 = vpop.f32.mrb[4].mxu0 }
  0xee   : > { %v457_v53 = vadd.f32 %v1199_v51, %v1449_v39  ;;  %v451_v54 = vpop.f32.mrb[5].mxu0 }
  0xef   : > { %v452_v55 = vadd.f32 %v1449_v39, %v451_v54  ;;  %1250 = vmatprep.mubr.msk.f32.mxu1 %vm633_vm1, %v592_v50 }
  0xf0   : > { %1251 = vmatmul.mubr.msk.f32.gmra.mrb[2].mxu1 %vm633_vm1, %v593_v52  ;;  %v595_v58 = vmax.f32 %v457_v53, 0.0 }
  0xf1   : > { %v594_v56 = vmax.f32 %v452_v55, 0.0  ;;  %v1202_v57 = vpop.f32.mrb[6].mxu0 }
  0xf2   : > { %v467_v59 = vadd.f32 %v1202_v57, %v1449_v39  ;;  %v461_v60 = vpop.f32.mrb[7].mxu0 }
  0xf3   : > { %v462_v61 = vadd.f32 %v1449_v39, %v461_v60  ;;  %1253 = vmatprep.mubr.msk.f32.mxu1 %vm633_vm1, %v594_v56 }
  0xf4   : > { %1254 = vmatmul.mubr.msk.f32.gmra.mrb[4].mxu1 %vm633_vm1, %v595_v58  ;;  %v597_v0 = vmax.f32 %v467_v59, 0.0 }
  0xf5   : > { %v596_v62 = vmax.f32 %v462_v61, 0.0  ;;  %v1205_v63 = vpop.f32.mrb[8].mxu0 }
  0xf6   : > { %v477_v1 = vadd.f32 %v1205_v63, %v1449_v39  ;;  %v471_v2 = vpop.f32.mrb[9].mxu0 }
  0xf7   : > { %v472_v3 = vadd.f32 %v1449_v39, %v471_v2  ;;  %1256 = vmatprep.mubr.msk.f32.mxu1 %vm633_vm1, %v596_v62 }
  0xf8   : > { %1257 = vmatmul.mubr.msk.f32.gmra.mrb[6].mxu1 %vm633_vm1, %v597_v0  ;;  %v599_v6 = vmax.f32 %v477_v1, 0.0 }
  0xf9   : > { %v598_v4 = vmax.f32 %v472_v3, 0.0  ;;  %v1208_v5 = vpop.f32.mrb[10].mxu0 }
  0xfa   : > { %v487_v7 = vadd.f32 %v1208_v5, %v1449_v39  ;;  %v481_v8 = vpop.f32.mrb[11].mxu0 }
  0xfb   : > { %v482_v9 = vadd.f32 %v1449_v39, %v481_v8  ;;  %1259 = vmatprep.mubr.msk.f32.mxu1 %vm633_vm1, %v598_v4 }
  0xfc   : > { %1260 = vmatmul.mubr.msk.f32.gmra.mrb[8].mxu1 %vm633_vm1, %v599_v6  ;;  %v601_v12 = vmax.f32 %v487_v7, 0.0 }
  0xfd   : > { %v600_v10 = vmax.f32 %v482_v9, 0.0  ;;  %v1211_v11 = vpop.f32.mrb[12].mxu0  ;;  %v1518_v9 = vld [vmem:[%s1598_s4] ss:$0 sm:$0xff] }
  0xfe   : > { %v497_v13 = vadd.f32 %v1211_v11, %v1449_v39  ;;  %v491_v14 = vpop.f32.mrb[13].mxu0 }
  0xff   : > { %v492_v15 = vadd.f32 %v1449_v39, %v491_v14  ;;  %1262 = vmatprep.mubr.msk.f32.mxu1 %vm633_vm1, %v600_v10 }
 0x100   : > { %1263 = vmatmul.mubr.msk.f32.gmra.mrb[10].mxu1 %vm633_vm1, %v601_v12  ;;  %v603_v18 = vmax.f32 %v497_v13, 0.0 }
 0x101   : > { %v602_v16 = vmax.f32 %v492_v15, 0.0  ;;  %v1214_v17 = vpop.f32.mrb[14].mxu0 }
 0x102   : > { %v507_v19 = vadd.f32 %v1214_v17, %v1449_v39  ;;  %v501_v20 = vpop.f32.mrb[15].mxu0 }
 0x103   : > { %v502_v21 = vadd.f32 %v1449_v39, %v501_v20  ;;  %1265 = vmatprep.mubr.msk.f32.mxu1 %vm633_vm1, %v602_v16 }
 0x104   : > { %1266 = vmatmul.mubr.msk.f32.gmra.mrb[12].mxu1 %vm633_vm1, %v603_v18  ;;  %v605_v24 = vmax.f32 %v507_v19, 0.0 }
 0x105   : > { %v604_v22 = vmax.f32 %v502_v21, 0.0  ;;  %v1217_v23 = vpop.f32.mrb[16].mxu0 }
 0x106   : > { %v517_v25 = vadd.f32 %v1217_v23, %v1449_v39  ;;  %v511_v26 = vpop.f32.mrb[17].mxu0 }
 0x107   : > { %v512_v27 = vadd.f32 %v1449_v39, %v511_v26  ;;  %1268 = vmatprep.mubr.msk.f32.mxu1 %vm633_vm1, %v604_v22 }
 0x108   : > { %1269 = vmatmul.mubr.msk.f32.gmra.mrb[14].mxu1 %vm633_vm1, %v605_v24  ;;  %v607_v30 = vmax.f32 %v517_v25, 0.0 }
 0x109   : > { %v606_v28 = vmax.f32 %v512_v27, 0.0  ;;  %v1220_v29 = vpop.f32.mrb[18].mxu0 }
 0x10a   : > { %v527_v31 = vadd.f32 %v1220_v29, %v1449_v39  ;;  %v521_v32 = vpop.f32.mrb[19].mxu0 }
 0x10b   : > { %v522_v33 = vadd.f32 %v1449_v39, %v521_v32  ;;  %1271 = vmatprep.mubr.msk.f32.mxu1 %vm633_vm1, %v606_v28 }
 0x10c   : > { %1272 = vmatmul.mubr.msk.f32.gmra.mrb[16].mxu1 %vm633_vm1, %v607_v30  ;;  %v609_v36 = vmax.f32 %v527_v31, 0.0 }
 0x10d   : > { %v608_v34 = vmax.f32 %v522_v33, 0.0  ;;  %v1223_v35 = vpop.f32.mrb[20].mxu0 }
 0x10e   : > { %v537_v37 = vadd.f32 %v1223_v35, %v1449_v39  ;;  %v531_v38 = vpop.f32.mrb[21].mxu0 }
 0x10f   : > { %v532_v40 = vadd.f32 %v1449_v39, %v531_v38  ;;  %1274 = vmatprep.mubr.msk.f32.mxu1 %vm633_vm1, %v608_v34 }
 0x110   : > { %1275 = vmatmul.mubr.msk.f32.gmra.mrb[18].mxu1 %vm633_vm1, %v609_v36  ;;  %v611_v43 = vmax.f32 %v537_v37, 0.0 }
 0x111   : > { %v610_v41 = vmax.f32 %v532_v40, 0.0  ;;  %v1226_v42 = vpop.f32.mrb[22].mxu0 }
 0x112   : > { %v547_v44 = vadd.f32 %v1226_v42, %v1449_v39  ;;  %v541_v45 = vpop.f32.mrb[23].mxu0 }
 0x113   : > { %v542_v46 = vadd.f32 %v1449_v39, %v541_v45  ;;  %1277 = vmatprep.mubr.msk.f32.mxu1 %vm633_vm1, %v610_v41 }
 0x114   : > { %1278 = vmatmul.mubr.msk.f32.gmra.mrb[20].mxu1 %vm633_vm1, %v611_v43  ;;  %v613_v49 = vmax.f32 %v547_v44, 0.0 }
 0x115   : > { %v612_v47 = vmax.f32 %v542_v46, 0.0  ;;  %v1229_v48 = vpop.f32.mrb[24].mxu0 }
 0x116   : > { %v557_v50 = vadd.f32 %v1229_v48, %v1449_v39  ;;  %v551_v51 = vpop.f32.mrb[25].mxu0 }
 0x117   : > { %v552_v52 = vadd.f32 %v1449_v39, %v551_v51  ;;  %1280 = vmatprep.mubr.msk.f32.mxu1 %vm633_vm1, %v612_v47 }
 0x118   : > { %1281 = vmatmul.mubr.msk.f32.gmra.mrb[22].mxu1 %vm633_vm1, %v613_v49  ;;  %v615_v55 = vmax.f32 %v557_v50, 0.0 }
 0x119   : > { %v614_v53 = vmax.f32 %v552_v52, 0.0  ;;  %v1232_v54 = vpop.f32.mrb[26].mxu0 }
 0x11a   : > { %v567_v56 = vadd.f32 %v1232_v54, %v1449_v39  ;;  %v561_v57 = vpop.f32.mrb[27].mxu0 }
 0x11b   : > { %v562_v58 = vadd.f32 %v1449_v39, %v561_v57  ;;  %1283 = vmatprep.mubr.msk.f32.mxu1 %vm633_vm1, %v614_v53 }
 0x11c   : > { %1284 = vmatmul.mubr.msk.f32.gmra.mrb[24].mxu1 %vm633_vm1, %v615_v55  ;;  %v617_v61 = vmax.f32 %v567_v56, 0.0 }
 0x11d   : > { %v616_v59 = vmax.f32 %v562_v58, 0.0  ;;  %v1235_v60 = vpop.f32.mrb[28].mxu0 }
 0x11e   : > { %v577_v62 = vadd.f32 %v1235_v60, %v1449_v39  ;;  %v571_v63 = vpop.f32.mrb[29].mxu0 }
 0x11f   : > { %v572_v0 = vadd.f32 %v1449_v39, %v571_v63  ;;  %1286 = vmatprep.mubr.msk.f32.mxu1 %vm633_vm1, %v616_v59 }
 0x120   : > { %1287 = vmatmul.mubr.msk.f32.gmra.mrb[26].mxu1 %vm633_vm1, %v617_v61  ;;  %v619_v3 = vmax.f32 %v577_v62, 0.0 }
 0x121   : > { %v618_v1 = vmax.f32 %v572_v0, 0.0  ;;  %v1238_v2 = vpop.f32.mrb[30].mxu0 }
 0x122   : > { %v587_v4 = vadd.f32 %v1238_v2, %v1449_v39  ;;  %v581_v5 = vpop.f32.mrb[31].mxu0 }
 0x123   : > { %v582_v6 = vadd.f32 %v1449_v39, %v581_v5  ;;  %1289 = vmatprep.mubr.msk.f32.mxu1 %vm633_vm1, %v618_v1 }
 0x124   : > { %1290 = vmatmul.mubr.msk.f32.gmra.mrb[28].mxu1 %vm633_vm1, %v619_v3  ;;  %v621_v8 = vmax.f32 %v587_v4, 0.0 }
 0x125   : > { %v620_v7 = vmax.f32 %v582_v6, 0.0 }
 0x127   : > { %1292 = vmatprep.mubr.msk.f32.mxu1 %vm633_vm1, %v620_v7 }
 0x128   : > { %1293 = vmatmul.mubr.msk.f32.gmra.mrb[30].mxu1 %vm633_vm1, %v621_v8 }
 0x1bf   : > { %v1249_v39 = vpop.f32.mrb[0].mxu1 }
 0x1c0   : > { %v802_v10 = vadd.f32 %v1249_v39, %v1518_v9  ;;  %v796_v11 = vpop.f32.mrb[1].mxu1 }
 0x1c1   : > { %v797_v12 = vadd.f32 %v1518_v9, %v796_v11 }
 0x1c2   : > { %956 = vst [vmem:[%s1525_s16 + $0x8] sm:$0xff] %v802_v10 }
 0x1c3   : > { %955 = vst [vmem:[%s1525_s16] sm:$0xff] %v797_v12  ;;  %v1252_v13 = vpop.f32.mrb[2].mxu1 }
 0x1c4   : > { %v812_v14 = vadd.f32 %v1252_v13, %v1518_v9  ;;  %v806_v15 = vpop.f32.mrb[3].mxu1 }
 0x1c5   : > { %v807_v16 = vadd.f32 %v1518_v9, %v806_v15 }
 0x1c6   : > { %958 = vst [vmem:[%s1525_s16 + $0x18] sm:$0xff] %v812_v14 }
 0x1c7   : > { %957 = vst [vmem:[%s1525_s16 + $0x10] sm:$0xff] %v807_v16  ;;  %v1255_v17 = vpop.f32.mrb[4].mxu1 }
 0x1c8   : > { %v822_v18 = vadd.f32 %v1255_v17, %v1518_v9  ;;  %v816_v19 = vpop.f32.mrb[5].mxu1 }
 0x1c9   : > { %v817_v20 = vadd.f32 %v1518_v9, %v816_v19 }
 0x1ca   : > { %960 = vst [vmem:[%s1525_s16 + $0x28] sm:$0xff] %v822_v18 }
 0x1cb   : > { %959 = vst [vmem:[%s1525_s16 + $0x20] sm:$0xff] %v817_v20  ;;  %v1258_v21 = vpop.f32.mrb[6].mxu1 }
 0x1cc   : > { %v832_v22 = vadd.f32 %v1258_v21, %v1518_v9  ;;  %v826_v23 = vpop.f32.mrb[7].mxu1 }
 0x1cd   : > { %v827_v24 = vadd.f32 %v1518_v9, %v826_v23 }
 0x1ce   : > { %962 = vst [vmem:[%s1525_s16 + $0x38] sm:$0xff] %v832_v22 }
 0x1cf   : > { %961 = vst [vmem:[%s1525_s16 + $0x30] sm:$0xff] %v827_v24  ;;  %v1261_v25 = vpop.f32.mrb[8].mxu1 }
 0x1d0   : > { %v842_v26 = vadd.f32 %v1261_v25, %v1518_v9  ;;  %v836_v27 = vpop.f32.mrb[9].mxu1 }
 0x1d1   : > { %v837_v28 = vadd.f32 %v1518_v9, %v836_v27 }
 0x1d2   : > { %964 = vst [vmem:[%s1525_s16 + $0x48] sm:$0xff] %v842_v26 }
 0x1d3   : > { %963 = vst [vmem:[%s1525_s16 + $0x40] sm:$0xff] %v837_v28  ;;  %v1264_v29 = vpop.f32.mrb[10].mxu1 }
 0x1d4   : > { %v852_v30 = vadd.f32 %v1264_v29, %v1518_v9  ;;  %v846_v31 = vpop.f32.mrb[11].mxu1 }
 0x1d5   : > { %v847_v32 = vadd.f32 %v1518_v9, %v846_v31 }
 0x1d6   : > { %966 = vst [vmem:[%s1525_s16 + $0x58] sm:$0xff] %v852_v30 }
 0x1d7   : > { %965 = vst [vmem:[%s1525_s16 + $0x50] sm:$0xff] %v847_v32  ;;  %v1267_v33 = vpop.f32.mrb[12].mxu1 }
 0x1d8   : > { %v862_v34 = vadd.f32 %v1267_v33, %v1518_v9  ;;  %v856_v35 = vpop.f32.mrb[13].mxu1 }
 0x1d9   : > { %v857_v36 = vadd.f32 %v1518_v9, %v856_v35 }
 0x1da   : > { %968 = vst [vmem:[%s1525_s16 + $0x68] sm:$0xff] %v862_v34 }
 0x1db   : > { %967 = vst [vmem:[%s1525_s16 + $0x60] sm:$0xff] %v857_v36  ;;  %v1270_v37 = vpop.f32.mrb[14].mxu1 }
 0x1dc   : > { %v872_v38 = vadd.f32 %v1270_v37, %v1518_v9  ;;  %v866_v40 = vpop.f32.mrb[15].mxu1 }
 0x1dd   : > { %v867_v41 = vadd.f32 %v1518_v9, %v866_v40 }
 0x1de   : > { %970 = vst [vmem:[%s1525_s16 + $0x78] sm:$0xff] %v872_v38 }
 0x1df   : > { %969 = vst [vmem:[%s1525_s16 + $0x70] sm:$0xff] %v867_v41  ;;  %v1273_v42 = vpop.f32.mrb[16].mxu1 }
 0x1e0   : > { %v882_v43 = vadd.f32 %v1273_v42, %v1518_v9  ;;  %v876_v44 = vpop.f32.mrb[17].mxu1 }
 0x1e1   : > { %v877_v45 = vadd.f32 %v1518_v9, %v876_v44 }
 0x1e2   : > { %972 = vst [vmem:[%s1525_s16 + $0x88] sm:$0xff] %v882_v43 }
 0x1e3   : > { %971 = vst [vmem:[%s1525_s16 + $0x80] sm:$0xff] %v877_v45  ;;  %v1276_v46 = vpop.f32.mrb[18].mxu1 }
 0x1e4   : > { %v892_v47 = vadd.f32 %v1276_v46, %v1518_v9  ;;  %v886_v48 = vpop.f32.mrb[19].mxu1 }
 0x1e5   : > { %v887_v49 = vadd.f32 %v1518_v9, %v886_v48 }
 0x1e6   : > { %974 = vst [vmem:[%s1525_s16 + $0x98] sm:$0xff] %v892_v47 }
 0x1e7   : > { %973 = vst [vmem:[%s1525_s16 + $0x90] sm:$0xff] %v887_v49  ;;  %v1279_v50 = vpop.f32.mrb[20].mxu1 }
 0x1e8   : > { %v902_v51 = vadd.f32 %v1279_v50, %v1518_v9  ;;  %v896_v52 = vpop.f32.mrb[21].mxu1 }
 0x1e9   : > { %v897_v53 = vadd.f32 %v1518_v9, %v896_v52 }
 0x1ea   : > { %976 = vst [vmem:[%s1525_s16 + $0xa8] sm:$0xff] %v902_v51 }
 0x1eb   : > { %975 = vst [vmem:[%s1525_s16 + $0xa0] sm:$0xff] %v897_v53  ;;  %v1282_v54 = vpop.f32.mrb[22].mxu1 }
 0x1ec   : > { %v912_v55 = vadd.f32 %v1282_v54, %v1518_v9  ;;  %v906_v56 = vpop.f32.mrb[23].mxu1 }
 0x1ed   : > { %v907_v57 = vadd.f32 %v1518_v9, %v906_v56 }
 0x1ee   : > { %978 = vst [vmem:[%s1525_s16 + $0xb8] sm:$0xff] %v912_v55 }
 0x1ef   : > { %977 = vst [vmem:[%s1525_s16 + $0xb0] sm:$0xff] %v907_v57  ;;  %v1285_v58 = vpop.f32.mrb[24].mxu1 }
 0x1f0   : > { %v922_v59 = vadd.f32 %v1285_v58, %v1518_v9  ;;  %v916_v60 = vpop.f32.mrb[25].mxu1 }
 0x1f1   : > { %v917_v61 = vadd.f32 %v1518_v9, %v916_v60 }
 0x1f2   : > { %980 = vst [vmem:[%s1525_s16 + $0xc8] sm:$0xff] %v922_v59 }
 0x1f3   : > { %979 = vst [vmem:[%s1525_s16 + $0xc0] sm:$0xff] %v917_v61  ;;  %v1288_v62 = vpop.f32.mrb[26].mxu1 }
 0x1f4   : > { %v932_v63 = vadd.f32 %v1288_v62, %v1518_v9  ;;  %v926_v0 = vpop.f32.mrb[27].mxu1 }
 0x1f5   : > { %v927_v1 = vadd.f32 %v1518_v9, %v926_v0 }
 0x1f6   : > { %982 = vst [vmem:[%s1525_s16 + $0xd8] sm:$0xff] %v932_v63 }
 0x1f7   : > { %981 = vst [vmem:[%s1525_s16 + $0xd0] sm:$0xff] %v927_v1  ;;  %v1291_v2 = vpop.f32.mrb[28].mxu1 }
 0x1f8   : > { %v942_v3 = vadd.f32 %v1291_v2, %v1518_v9  ;;  %v936_v4 = vpop.f32.mrb[29].mxu1 }
 0x1f9   : > { %v937_v5 = vadd.f32 %v1518_v9, %v936_v4 }
 0x1fa   : > { %984 = vst [vmem:[%s1525_s16 + $0xe8] sm:$0xff] %v942_v3 }
 0x1fb   : > { %983 = vst [vmem:[%s1525_s16 + $0xe0] sm:$0xff] %v937_v5  ;;  %v1294_v6 = vpop.f32.mrb[30].mxu1 }
 0x1fc   : > { %v952_v7 = vadd.f32 %v1294_v6, %v1518_v9  ;;  %v946_v8 = vpop.f32.mrb[31].mxu1 }
 0x1fd   : > { %v947_v39 = vadd.f32 %v1518_v9, %v946_v8 }
 0x1fe   : > { %986 = vst [vmem:[%s1525_s16 + $0xf8] sm:$0xff] %v952_v7 }
 0x1ff   : > { %985 = vst [vmem:[%s1525_s16 + $0xf0] sm:$0xff] %v947_v39 }
 0x200 PF: > { %s15_s18 = sadd.s32 1, %s1317_s18  }
 0x201   : > { %p12_p4 = scmp.ge.s32.totalorder %s15_s18, 4  }
 0x203   :  { %14 = sbr.rel (!%p12_p4) target bundleno = 1 (0x1), region = 70 }

</bundles_post_ra>
